<compile_context>
chip_gen: v7x
topology: tpu7x:2x2x1
jax: 0.10.0
libtpu: 0.0.40
codegen_flags: <defaults>
</compile_context>

<pallas_src>
import functools
import math

import jax
import jax.numpy as jnp
from jax import lax
from jax.experimental import pallas as pl
from jax.experimental.pallas import tpu as pltpu

LANE = 128            # vreg lane width
SUBLANE = 8           # f32 sublanes per vreg
# Per-input block byte budget (f32: 4096 x 128).  2 inputs x 2 pipeline
# buffers x 2 MiB = 8 MiB of input buffers per kernel.
MAX_BLOCK_BYTES = 2 * 1024 * 1024
# Raised scoped-VMEM limit: matches the v6e/v7x default, lifts v5e's 16 MiB
# default so the 2 MiB blocks + elementwise temporaries fit comfortably.
VMEM_LIMIT_BYTES = 32 * 1024 * 1024

_LOG2 = math.log(2.0)


def _round_up(a, b):
    return ((a + b - 1) // b) * b


def _stable_logcosh(diff, sub_log2):
    # log(cosh(x)) = |x| + log1p(exp(-2|x|)) - log(2).
    # The constant -log(2) can be hoisted out of the kernel when only the SUM
    # of logcosh is needed (non-reciprocal global mean).
    a = jnp.abs(diff)
    lc = a + jnp.log1p(jnp.exp(-2.0 * a))
    if sub_log2:
        lc = lc - jnp.float32(_LOG2)
    return lc


# ------------------------- kernels -------------------------

def _logcosh_sum_kernel(meta_ref, pred_ref, true_ref, acc_ref, *,
                        reciprocal, needs_mask):
    """Accumulates per-tile partial sums into a resident (8, C) f32 block."""
    s = pl.program_id(0)          # split axis (parallel; one per TC on v7x)
    i = pl.program_id(1)          # tile within split (reduction / arbitrary)
    steps = pl.num_programs(1)

    @pl.when(i == 0)
    def _():
        acc_ref[...] = jnp.zeros_like(acc_ref)

    tile_rows, cols = pred_ref.shape
    diff = pred_ref[...].astype(jnp.float32) - true_ref[...].astype(jnp.float32)
    # -log(2) hoisted to the wrapper for the plain (non-reciprocal) sum.
    lc = _stable_logcosh(diff, sub_log2=reciprocal)
    if reciprocal:
        # Exact divide keeps parity with the PyTorch reference.
        # TODO(synk): pl.reciprocal(lc, approx=True) would free EUP/VPU slots on
        # v7x at the cost of a few ULPs vs. the reference.
        lc = 1.0 / lc

    def fold(v):
        # (tile_rows, C) -> (8, C) with cheap vreg-wise adds (no XLU reduce).
        return v.reshape(-1, SUBLANE, cols).sum(axis=0)

    if needs_mask:
        # Only boundary tiles (last real tile and clamped/duplicated tiles)
        # pay for the mask; interior tiles accumulate unmasked.
        gstep = s * steps + i
        full_rows = meta_ref[0]       # rows that are entirely valid
        tail_cols = meta_ref[1]       # valid cols in row `full_rows` (0 if none)
        is_boundary = (gstep + 1) * tile_rows > full_rows

        @pl.when(is_boundary)
        def _():
            row = gstep * tile_rows + lax.broadcasted_iota(jnp.int32, lc.shape, 0)
            col = lax.broadcasted_iota(jnp.int32, lc.shape, 1)
            valid = (row < full_rows) | ((row == full_rows) & (col < tail_cols))
            acc_ref[...] += fold(jnp.where(valid, lc, 0.0))

        @pl.when(jnp.logical_not(is_boundary))
        def _():
            acc_ref[...] += fold(lc)
    else:
        acc_ref[...] += fold(lc)


def _logcosh_rowmean_kernel(pred_ref, true_ref, out_ref, *, reciprocal, red_size):
    """Fused mean over a trailing reduced axis: (tile_rows, red) -> (tile_rows, 1)."""
    diff = pred_ref[...].astype(jnp.float32) - true_ref[...].astype(jnp.float32)
    lc = _stable_logcosh(diff, sub_log2=True)
    if reciprocal:
        lc = 1.0 / lc
    mean = lc.sum(axis=1, keepdims=True) * jnp.float32(1.0 / red_size)
    out_ref[...] = mean.astype(out_ref.dtype)


def _logcosh_elem_kernel(pred_ref, true_ref, out_ref, *, reciprocal):
    """Elementwise loss in float32 (used for non-trailing `dim` reductions)."""
    diff = pred_ref[...].astype(jnp.float32) - true_ref[...].astype(jnp.float32)
    lc = _stable_logcosh(diff, sub_log2=True)
    if reciprocal:
        lc = 1.0 / lc
    out_ref[...] = lc.astype(out_ref.dtype)


# ------------------------- wrapper helpers -------------------------

def _tile_rows_for(num_rows, cols, itemsize):
    """Largest row-tile (multiple of 8) fitting MAX_BLOCK_BYTES, capped at the array."""
    budget = max(SUBLANE,
                 (MAX_BLOCK_BYTES // max(cols * itemsize, 1)) // SUBLANE * SUBLANE)
    return min(budget, _round_up(max(num_rows, 1), SUBLANE))


def _pad_slab(x, n, rows):
    """(rows, 128) slab of x; pads the tail.  Fallback only (extra HBM copy)."""
    flat = x.reshape(-1)
    pad = rows * LANE - n
    if pad:
        flat = jnp.pad(flat, (0, pad))
    return flat.reshape(rows, LANE)


def _normalize_dims(dim, ndim):
    if isinstance(dim, (list, tuple)):
        dims = tuple(int(d) % ndim for d in dim)
    else:
        dims = (int(dim) % ndim,)
    return tuple(sorted(set(dims)))


def _mean_all_pallas(y_pred, y_true, reciprocal):
    n = math.prod(y_pred.shape)
    itemsize = jnp.dtype(y_pred.dtype).itemsize

    # Pick a 2-D "slab" view that is a pure metadata reshape (no HBM copy).
    if n % LANE == 0:
        rows, cols = n // LANE, LANE
        p2d = y_pred.reshape(rows, cols)
        t2d = y_true.reshape(rows, cols)
    else:
        cols = y_pred.shape[-1] if y_pred.ndim >= 2 else max(n, 1)
        if SUBLANE * cols * itemsize <= MAX_BLOCK_BYTES:
            rows = max(n // cols, 1)
            p2d = y_pred.reshape(rows, cols)
            t2d = y_true.reshape(rows, cols)
        else:
            # Pathological shape (huge odd last dim): padded 128-lane slab.
            # Only path that copies the inputs.
            rows, cols = pl.cdiv(n, LANE), LANE
            p2d = _pad_slab(y_pred, n, rows)
            t2d = _pad_slab(y_true, n, rows)

    full_rows, tail_cols = n // cols, n % cols
    tile_rows = _tile_rows_for(rows, cols, itemsize)
    num_tiles = pl.cdiv(rows, tile_rows)

    # Two partial-sum blocks so both TensorCores of a v7x chip participate.
    splits = 2 if num_tiles >= 2 else 1
    steps = pl.cdiv(num_tiles, splits)
    needs_mask = (splits * steps * tile_rows != full_rows) or (tail_cols != 0)

    meta = jnp.array([full_rows, tail_cols], dtype=jnp.int32)

    def in_map(s, i, meta_ref):
        # Clamp so an odd tile count never indexes past the array; the
        # duplicated tile's contribution is masked to zero in the kernel.
        return (jnp.minimum(s * steps + i, num_tiles - 1), 0)

    kernel = functools.partial(_logcosh_sum_kernel, reciprocal=reciprocal,
                               needs_mask=needs_mask)
    partials = pl.pallas_call(
        kernel,
        out_shape=jax.ShapeDtypeStruct((splits * SUBLANE, cols), jnp.float32),
        grid_spec=pltpu.PrefetchScalarGridSpec(
            num_scalar_prefetch=1,
            grid=(splits, steps),
            in_specs=[pl.BlockSpec((tile_rows, cols), in_map)] * 2,
            out_specs=pl.BlockSpec((SUBLANE, cols),
                                   lambda s, i, meta_ref: (s, 0)),
        ),
        compiler_params=pltpu.CompilerParams(
            dimension_semantics=("parallel", "arbitrary"),
            vmem_limit_bytes=VMEM_LIMIT_BYTES),
    )(meta, p2d, t2d)

    # TODO(synk): for tiny inputs the trailing sum + divide could be folded into
    # a last-step epilogue inside the kernel to shave two XLA op dispatches.
    mean = jnp.sum(partials, dtype=jnp.float32) / n
    if not reciprocal:
        mean = mean - jnp.float32(_LOG2)   # hoisted -log(2)
    return mean.astype(y_pred.dtype)


def _mean_trailing_pallas(y_pred, y_true, reciprocal, keep_shape, red_size):
    keep_rows = math.prod(keep_shape)
    itemsize = jnp.dtype(y_pred.dtype).itemsize
    p2d = y_pred.reshape(keep_rows, red_size)
    t2d = y_true.reshape(keep_rows, red_size)

    tile_rows = _tile_rows_for(keep_rows, red_size, itemsize)
    num_tiles = pl.cdiv(keep_rows, tile_rows)

    kernel = functools.partial(_logcosh_rowmean_kernel, reciprocal=reciprocal,
                               red_size=red_size)
    out2d = pl.pallas_call(
        kernel,
        out_shape=jax.ShapeDtypeStruct((keep_rows, 1), y_pred.dtype),
        grid_spec=pltpu.PrefetchScalarGridSpec(
            num_scalar_prefetch=0,
            grid=(num_tiles,),
            in_specs=[pl.BlockSpec((tile_rows, red_size), lambda i: (i, 0))] * 2,
            out_specs=pl.BlockSpec((tile_rows, 1), lambda i: (i, 0)),
        ),
        compiler_params=pltpu.CompilerParams(
            dimension_semantics=("parallel",),
            vmem_limit_bytes=VMEM_LIMIT_BYTES),
    )(p2d, t2d)
    return out2d.reshape(keep_shape)


def _elementwise_loss_pallas(y_pred, y_true, reciprocal):
    shape = y_pred.shape
    cols = shape[-1]
    rows = math.prod(shape[:-1])
    itemsize = jnp.dtype(y_pred.dtype).itemsize
    p2d = y_pred.reshape(rows, cols)
    t2d = y_true.reshape(rows, cols)

    tile_rows = _tile_rows_for(rows, cols, itemsize)
    num_tiles = pl.cdiv(rows, tile_rows)

    kernel = functools.partial(_logcosh_elem_kernel, reciprocal=reciprocal)
    loss2d = pl.pallas_call(
        kernel,
        out_shape=jax.ShapeDtypeStruct((rows, cols), jnp.float32),
        grid_spec=pltpu.PrefetchScalarGridSpec(
            num_scalar_prefetch=0,
            grid=(num_tiles,),
            in_specs=[pl.BlockSpec((tile_rows, cols), lambda i: (i, 0))] * 2,
            out_specs=pl.BlockSpec((tile_rows, cols), lambda i: (i, 0)),
        ),
        compiler_params=pltpu.CompilerParams(
            dimension_semantics=("parallel",),
            vmem_limit_bytes=VMEM_LIMIT_BYTES),
    )(p2d, t2d)
    return loss2d.reshape(shape)   # float32 elementwise loss


# ------------------------- public API -------------------------

def reciprocal_logcosh_loss(y_pred, y_true, reg_lambda=0.001,
                            reciprocal=False, dim=None):
    # reg_lambda is unused in the reference forward; kept for API parity.
    del reg_lambda
    assert y_pred.shape == y_true.shape
    shape = y_pred.shape
    ndim = len(shape)
    itemsize = jnp.dtype(y_pred.dtype).itemsize

    if dim is None:
        return _mean_all_pallas(y_pred, y_true, reciprocal)

    dims = _normalize_dims(dim, ndim)
    trailing = dims == tuple(range(ndim - len(dims), ndim))
    red_size = math.prod(shape[d] for d in dims) if dims else 1

    if trailing and SUBLANE * red_size * itemsize <= MAX_BLOCK_BYTES:
        keep_shape = shape[:ndim - len(dims)]
        return _mean_trailing_pallas(y_pred, y_true, reciprocal,
                                     keep_shape, red_size)

    if ndim >= 2 and SUBLANE * shape[-1] * itemsize <= MAX_BLOCK_BYTES:
        loss = _elementwise_loss_pallas(y_pred, y_true, reciprocal)
        return jnp.mean(loss, axis=dims).astype(y_pred.dtype)

    # TODO(synk): no efficient Pallas layout for reductions over huge
    # non-trailing axes; fall back to plain XLA for these pathological shapes.
    diff = y_pred.astype(jnp.float32) - y_true.astype(jnp.float32)
    lc = _stable_logcosh(diff, sub_log2=True)
    if reciprocal:
        lc = 1.0 / lc
    return jnp.mean(lc, axis=dims).astype(y_pred.dtype)


# ------------------------- demo -------------------------

if __name__ == "__main__":
    key = jax.random.PRNGKey(0)
    k1, k2, k3, k4, k5, k6 = jax.random.split(key, 6)

    def ref_loss(p, t, reciprocal=False, dim=None):
        lc = jnp.log(jnp.cosh(p - t))
        lc = 1.0 / lc if reciprocal else lc
        return jnp.mean(lc) if dim is None else jnp.mean(lc, axis=dim)

    # NCHW-like regression target.
    y_pred = jax.random.normal(k1, (2, 4, 16, 16), dtype=jnp.float32)
    y_true = jax.random.normal(k2, (2, 4, 16, 16), dtype=jnp.float32)

    # 1) default config: scalar mean, element count % 128 == 0.
    loss = jax.block_until_ready(reciprocal_logcosh_loss(y_pred, y_true))
    assert jnp.allclose(loss, ref_loss(y_pred, y_true), rtol=1e-5, atol=1e-6)

    # 2) ragged element count (not a multiple of 128): metadata-only (105, 11)
    #    view, boundary-tile masking (no jnp.pad copy).
    yp2 = jax.random.normal(k3, (3, 5, 7, 11), dtype=jnp.float32)
    yt2 = jax.random.normal(k4, (3, 5, 7, 11), dtype=jnp.float32)
    loss2 = jax.block_until_ready(reciprocal_logcosh_loss(yp2, yt2))
    assert jnp.allclose(loss2, ref_loss(yp2, yt2), rtol=1e-5, atol=1e-6)

    # 3) multi-tile + 2-way split + clamped duplicate tile (megacore path).
    yp3 = jax.random.normal(k5, (2, 4, 1024, 160), dtype=jnp.float32)
    yt3 = jax.random.normal(k6, (2, 4, 1024, 160), dtype=jnp.float32)
    loss3 = jax.block_until_ready(reciprocal_logcosh_loss(yp3, yt3))
    assert jnp.allclose(loss3, ref_loss(yp3, yt3), rtol=1e-4, atol=1e-6)

    # 4) reciprocal path (diff bounded away from 0 so 1/logcosh is well-behaved).
    yt4 = y_pred - (1.0 + jnp.abs(y_true))
    loss4 = jax.block_until_ready(
        reciprocal_logcosh_loss(y_pred, yt4, reciprocal=True))
    assert jnp.allclose(loss4, ref_loss(y_pred, yt4, reciprocal=True),
                        rtol=1e-5, atol=1e-6)

    # 5) trailing-dims mean, fused in-kernel (no elementwise slab in HBM).
    loss5 = jax.block_until_ready(
        reciprocal_logcosh_loss(y_pred, y_true, dim=(2, 3)))
    assert loss5.shape == (2, 4)
    assert jnp.allclose(loss5, ref_loss(y_pred, y_true, dim=(2, 3)),
                        rtol=1e-5, atol=1e-6)

    # 6) non-trailing dim: elementwise-f32 kernel + thin jnp.mean.
    loss6 = jax.block_until_ready(
        reciprocal_logcosh_loss(y_pred, y_true, dim=1))
    assert loss6.shape == (2, 16, 16)
    assert jnp.allclose(loss6, ref_loss(y_pred, y_true, dim=1),
                        rtol=1e-5, atol=1e-6)

    print("KERNEL_OK")
</pallas_src>

<mosaic_0001>
module attributes {stable_mosaic.version = 11 : i64} {
  func.func @_logcosh_sum_kernel(%arg0: i32, %arg1: i32, %arg2: memref<2xi32, #tpu.memory_space<smem>>, %arg3: memref<16x128xf32, #tpu.memory_space<vmem>>, %arg4: memref<16x128xf32, #tpu.memory_space<vmem>>, %arg5: memref<8x128xf32, #tpu.memory_space<vmem>>) attributes {dimension_semantics = [#tpu.dimension_semantics<parallel>, #tpu.dimension_semantics<arbitrary>], iteration_bounds = array<i64: 1, 1>, scalar_prefetch = 1 : i64, scratch_operands = 0 : i64, tpu.core_type = #tpu.core_type<tc>, window_params = [{transform_indices = @transform_0, window_bounds = array<i64: 16, 128>}, {transform_indices = @transform_1, window_bounds = array<i64: 16, 128>}, {transform_indices = @transform_2, window_bounds = array<i64: 8, 128>}]} {
    %c0_i32 = arith.constant 0 : i32
    %0 = arith.cmpi eq, %arg1, %c0_i32 : i32
    %1 = arith.extui %0 : i1 to i32
    %c0_i32_0 = arith.constant 0 : i32
    %2 = arith.cmpi ne, %1, %c0_i32_0 : i32
    scf.if %2 {
      %cst_9 = arith.constant 0.000000e+00 : f32
      %17 = vector.broadcast %cst_9 : f32 to vector<8x128xf32>
      %c0_10 = arith.constant 0 : index
      %c0_11 = arith.constant 0 : index
      %18 = vector.load %arg5[%c0_10, %c0_11] : memref<8x128xf32, #tpu.memory_space<vmem>>, vector<8x128xf32>
      tpu.vector_store %arg5[%c0_10, %c0_11], %17 {strides = array<i32>} : memref<8x128xf32, #tpu.memory_space<vmem>>, vector<8x128xf32>,
    } else {
    }
    %c0 = arith.constant 0 : index
    %c0_1 = arith.constant 0 : index
    %3 = vector.load %arg3[%c0, %c0_1] : memref<16x128xf32, #tpu.memory_space<vmem>>, vector<16x128xf32>
    %c0_2 = arith.constant 0 : index
    %c0_3 = arith.constant 0 : index
    %4 = vector.load %arg4[%c0_2, %c0_3] : memref<16x128xf32, #tpu.memory_space<vmem>>, vector<16x128xf32>
    %5 = arith.subf %3, %4 : vector<16x128xf32>
    %6 = math.absf %5 : vector<16x128xf32>
    %cst = arith.constant -2.000000e+00 : f32
    %7 = vector.broadcast %cst : f32 to vector<16x128xf32>
    %8 = arith.mulf %7, %6 : vector<16x128xf32>
    %9 = math.exp %8 : vector<16x128xf32>
    %10 = math.log1p %9 : vector<16x128xf32>
    %11 = arith.addf %6, %10 : vector<16x128xf32>
    %c0_4 = arith.constant 0 : index
    %c0_5 = arith.constant 0 : index
    %12 = vector.load %arg5[%c0_4, %c0_5] : memref<8x128xf32, #tpu.memory_space<vmem>>, vector<8x128xf32>
    %13 = vector.shape_cast %11 : vector<16x128xf32> to vector<2x8x128xf32>
    %cst_6 = arith.constant dense<0.000000e+00> : vector<8x128xf32>
    %14 = vector.multi_reduction <add>, %13, %cst_6 [0] : vector<2x8x128xf32> to vector<8x128xf32>
    %15 = arith.addf %12, %14 : vector<8x128xf32>
    %c0_7 = arith.constant 0 : index
    %c0_8 = arith.constant 0 : index
    %16 = vector.load %arg5[%c0_7, %c0_8] : memref<8x128xf32, #tpu.memory_space<vmem>>, vector<8x128xf32>
    tpu.vector_store %arg5[%c0_7, %c0_8], %15 {strides = array<i32>} : memref<8x128xf32, #tpu.memory_space<vmem>>, vector<8x128xf32>,
    return
  }
  func.func @transform_0(%arg0: i32, %arg1: i32, %arg2: memref<2xi32, #tpu.memory_space<smem>>) -> (i32, i32) {
    %c1_i32 = arith.constant 1 : i32
    %0 = arith.muli %arg0, %c1_i32 : i32
    %1 = arith.addi %0, %arg1 : i32
    %c0_i32 = arith.constant 0 : i32
    %2 = arith.minsi %1, %c0_i32 : i32
    %c0_i32_0 = arith.constant 0 : i32
    %c0_i32_1 = arith.constant 0 : i32
    return %2, %c0_i32_0 : i32, i32
  }
  func.func @transform_1(%arg0: i32, %arg1: i32, %arg2: memref<2xi32, #tpu.memory_space<smem>>) -> (i32, i32) {
    %c1_i32 = arith.constant 1 : i32
    %0 = arith.muli %arg0, %c1_i32 : i32
    %1 = arith.addi %0, %arg1 : i32
    %c0_i32 = arith.constant 0 : i32
    %2 = arith.minsi %1, %c0_i32 : i32
    %c0_i32_0 = arith.constant 0 : i32
    %c0_i32_1 = arith.constant 0 : i32
    return %2, %c0_i32_0 : i32, i32
  }
  func.func @transform_2(%arg0: i32, %arg1: i32, %arg2: memref<2xi32, #tpu.memory_space<smem>>) -> (i32, i32) {
    %c0_i32 = arith.constant 0 : i32
    %c0_i32_0 = arith.constant 0 : i32
    return %arg0, %c0_i32 : i32, i32
  }
}

</mosaic_0001>

<bundles_post_ra>
// kernel: tpu_custom_call.1
= control target key start
LH: loop header
LB: loop body
LE: loop exit
PB: predicated region body
PF: predicated region fallthrough
CT: control target
= control target key end

     0   :  { %s301_s0 = inlined_call_operand.hbm [shape: s32[2], index: 0, kind: input, shape index: {}]   ;;  %s302_s1 = inlined_call_operand.hbm [shape: f32[16,128], index: 1, kind: input, shape index: {}]   ;;  %s303_s2 = inlined_call_operand.hbm [shape: f32[16,128], index: 2, kind: input, shape index: {}]   ;;  %s304_s3 = inlined_call_operand.hbm [shape: f32[8,128], index: 3, kind: output, shape index: {}]  }
   0x1   :  { %s143_s14 = scalar_lea.hbm %s301_s0, 16 }
   0x2   :  { %p144_p0 = scmp.ne.s32.totalorder %s301_s0, %s143_s14  ;;  %p147_p1 = scmp.lt.u32.totalorder %s143_s14, %s301_s0 }
   0x4   :  { %p149_p2 = pnand %p147_p1, %p144_p0 }
   0x6   :  { %152 = shalt.err (!%p149_p2)  }
   0x7   :  { %s227_s19 = smov [#allocation3]  }
   0x8   :  { %9 = dma.hbm_to_smem %s301_s0, 16, %s227_s19, [#allocation2] }
   0x9   :  { %219 = dma.done.wait [#allocation2], 16 }
   0xa   :  { %220 = vsyncadd [#allocation2], 4294967280 }
   0xb   :  { %11 = sfence }
   0xc   :  { %12 = vsyncpa [#allocation5], 0 }
   0xd   :  { %13 = vsyncpa [#allocation8], 0 }
   0xe   :  { %14 = vsyncpa [#allocation6], 0  ;;  %s228_s22 = smov [#allocation4]   ;;  %s153_s26 = scalar_lea.hbm %s302_s1, 256 }
   0xf   :  { %s26_s23 = sshll.u32 %s228_s22, 4  ;;  %p154_p3 = scmp.ne.s32.totalorder %s302_s1, %s153_s26  ;;  %s27_s23 = int_to_ptr.vmem [resolvable:$true] %s26_s23 }
  0x10   :  { %p157_p4 = scmp.lt.u32.totalorder %s153_s26, %s302_s1 }
  0x12   :  { %p159_p5 = pnand %p157_p4, %p154_p3 }
  0x14   :  { %162 = shalt.err (!%p159_p5)
}
  0x15   :  { %s163_s0 = scalar_lea.vmem %s27_s23, 256  ;;  %p168_p7 = scmp.lt.s32.totalorder %s27_s23, %s27_s23 }
  0x16   :  { %p164_p6 = scmp.ne.s32.totalorder %s27_s23, %s163_s0  ;;  %p169_p8 = scmp.lt.s32.totalorder %s163_s0, %s163_s0 }
  0x18   :  { %p170_p9 = por %p169_p8, %p168_p7 }
  0x1a   :  { %p171_p10 = pnand %p170_p9, %p164_p6 }
  0x1c   :  { %174 = shalt.err (!%p171_p10)
}
  0x1d   :  { %s229_s4 = smov 128   ;;  %s230_s5 = smov 8  }
  0x1e   :  { %32 = dma.hbm_to_vmem [thread:$0]  %s302_s1, 256, %s27_s23, [#allocation5], %s229_s4, %s229_s4, %s230_s5  }
  0x1f   :  { %s231_s8 = smov [#allocation7]   ;;  %s175_s12 = scalar_lea.hbm %s303_s2, 256 }
  0x20   :  { %s44_s9 = sshll.u32 %s231_s8, 4  ;;  %p176_p11 = scmp.ne.s32.totalorder %s303_s2, %s175_s12  ;;  %s45_s9 = int_to_ptr.vmem [resolvable:$true] %s44_s9 }
  0x21   :  { %p179_p12 = scmp.lt.u32.totalorder %s175_s12, %s303_s2 }
  0x23   :  { %p181_p13 = pnand %p179_p12, %p176_p11 }
  0x25   :  { %184 = shalt.err (!%p181_p13)
}
  0x26   :  { %s185_s17 = scalar_lea.vmem %s45_s9, 256  ;;  %p190_p1 = scmp.lt.s32.totalorder %s45_s9, %s45_s9 }
  0x27   :  { %p186_p0 = scmp.ne.s32.totalorder %s45_s9, %s185_s17  ;;  %p191_p2 = scmp.lt.s32.totalorder %s185_s17, %s185_s17 }
  0x29   :  { %p192_p3 = por %p191_p2, %p190_p1 }
  0x2b   :  { %p193_p4 = pnand %p192_p3, %p186_p0 }
  0x2d   :  { %196 = shalt.err (!%p193_p4)
}
  0x2e   :  { %50 = dma.hbm_to_vmem [thread:$0]  %s303_s2, 256, %s45_s9, [#allocation8], %s229_s4, %s229_s4, %s230_s5  }
  0x2f   :  { %221 = dma.done.wait [#allocation5], 256  }
  0x30   :  { %222 = vsyncadd [#allocation5], 4294967040 }
  0x31   :  { %223 = dma.done.wait [#allocation8], 256  }
  0x32   :  { %224 = vsyncadd [#allocation8], 4294967040  ;;  %v70_v0 = vld [vmem:[#allocation4] sm:$0xff]  ;;  %v71_v1 = vld [vmem:[#allocation4 + $0x8] sm:$0xff]  ;;  %s232_s2 = smov [#allocation9]  }
  0x33   :  { %v72_v2 = vld [vmem:[#allocation7] sm:$0xff]  ;;  %v73_v3 = vld [vmem:[#allocation7 + $0x8] sm:$0xff]  ;;  %s114_s19 = sshll.u32 %s232_s2, 4  ;;  %s115_s19 = int_to_ptr.vmem [resolvable:$true] %s114_s19 }
  0x34   :  { %v74_v4 = vsub.f32 %v70_v0, %v72_v2  ;;  %v75_v5 = vsub.f32 %v71_v1, %v73_v3  ;;  %s197_s20 = scalar_lea.vmem %s115_s19, 128  ;;  %p202_p6 = scmp.lt.s32.totalorder %s115_s19, %s115_s19 }
  0x35   :  { %p198_p5 = scmp.ne.s32.totalorder %s115_s19, %s197_s20  ;;  %p203_p7 = scmp.lt.s32.totalorder %s197_s20, %s197_s20 }
  0x36   :  { %v76_v6 = vand.u32 2147483647, %v74_v4  ;;  %v77_v7 = vand.u32 2147483647, %v75_v5 }
  0x37   :  { %p204_p8 = por %p203_p7, %p202_p6 }
  0x38   :  { %v78_v8 = vmul.f32 -2.0, %v76_v6  ;;  %v79_v9 = vmul.f32 -2.0, %v77_v7 }
  0x39   :  { %p205_p9 = pnand %p204_p8, %p198_p5 }
  0x3a   :  { %v80_v10 = vmul.f32 1.442695, %v78_v8  ;;  %v82_v11 = vmul.f32 1.442695, %v79_v9 }
  0x3c   :  { %135 = vpow2.f32 %v80_v10 }
  0x3d   :  { %137 = vpow2.f32 %v82_v11 }
  0x46   :  { %v136_v12 = vpop.eup %135 }
  0x47   :  { %v138_v13 = vpop.eup %137  ;;  %v84_v14 = vadd.f32 1.0, %v136_v12  ;;  %v87_v16 = vmul.f32 -0.5, %v136_v12  ;;  %v90_v19 = vand.u32 2147483647, %v136_v12 }
  0x48   :  { %v93_v15 = vadd.f32 1.0, %v138_v13  ;;  %v96_v17 = vmul.f32 -0.5, %v138_v13  ;;  %v99_v21 = vand.u32 2147483647, %v138_v13 }
  0x49   :  { %139 = vlog2.f32 %v84_v14  ;;  %v88_v18 = vadd.f32 1.0, %v87_v16  ;;  %vm91_vm0 = vcmp.lt.f32.partialorder %v90_v19, 0.0004427343 }
  0x4a   :  { %141 = vlog2.f32 %v93_v15  ;;  %v97_v20 = vadd.f32 1.0, %v96_v17  ;;  %vm100_vm1 = vcmp.lt.f32.partialorder %v99_v21, 0.0004427343 }
  0x4b   :  { %v89_v22 = vmul.f32 %v136_v12, %v88_v18 }
  0x4c   :  { %v98_v24 = vmul.f32 %v138_v13, %v97_v20 }
  0x53   :  { %v140_v23 = vpop.eup %139 }
  0x54   :  { %v142_v25 = vpop.eup %141  ;;  %v86_v26 = vmul.f32 0.6931472, %v140_v23 }
  0x55   :  { %v95_v27 = vmul.f32 0.6931472, %v142_v25 }
  0x56   :  { %v92_v28 = vsel %vm91_vm0, %v89_v22, %v86_v26 }
  0x57   :  { %v101_v29 = vsel %vm100_vm1, %v98_v24, %v95_v27  ;;  %v102_v30 = vadd.f32 %v92_v28, %v76_v6 }
  0x58   :  { %v103_v31 = vadd.f32 %v101_v29, %v77_v7 }
  0x5a   :  { %v105_v32 = vadd.f32 %v103_v31, %v102_v30 }
  0x5c   :  { %107 = vst [vmem:[#allocation9] sm:$0xff] %v105_v32 }
  0x5d   :  { %208 = shalt.err (!%p205_p9)
}
  0x5e   :  { %s209_s23 = scalar_lea.hbm %s304_s3, 128 }
  0x5f   :  { %p210_p10 = scmp.ne.s32.totalorder %s304_s3, %s209_s23  ;;  %p213_p11 = scmp.lt.u32.totalorder %s209_s23, %s304_s3 }
  0x61   :  { %p215_p12 = pnand %p213_p11, %p210_p10 }
  0x63   :  { %218 = shalt.err (!%p215_p12)
}
  0x64   :  { %117 = dma.vmem_to_hbm [thread:$0]  %s115_s19, 128, %s304_s3, [#allocation6]  }
  0x65   :  { %225 = dma.done.wait [#allocation6], 128  }
  0x66   :  { %226 = vsyncadd [#allocation6], 4294967168 }
  0x67   :  { %121 = vsyncpa [#allocation5], 1 }
  0x68   :  { %122 = vsyncpa [#allocation8], 1 }
  0x69   :  { %123 = vsyncpa [#allocation6], 1 }

</bundles_post_ra>
